<compile_context>
chip_gen: v5e
topology: v5e:2x2
jax: 0.10.0
libtpu: 0.0.40
codegen_flags: <defaults>
</compile_context>

<pallas_src>
import jax
import jax.numpy as jnp
from jax.experimental import pallas as pl
from jax.experimental.pallas import tpu as pltpu


def _round_up(v, m):
    return ((v + m - 1) // m) * m


def linear_kernel(x_ref, wbig_ref, b_ref, o_ref):
    # x_ref:    (TR, 128) f32 VMEM - flat row-major x, features interleaved on lanes
    # wbig_ref: (128, G)  f32 VMEM - block-diagonal weight / lane-compaction matrix
    # b_ref:    (1,)      f32 SMEM
    # o_ref:    (TR, G)   f32 VMEM - dense outputs; flat index == batch index
    acc = jnp.dot(
        x_ref[...],
        wbig_ref[...],
        preferred_element_type=jnp.float32,
        precision=jax.lax.Precision.HIGHEST,
    )
    o_ref[...] = (acc + b_ref[0]).astype(o_ref.dtype)


def linear_net_forward(x, w, b):
    """Pallas implementation of LinearNet.forward.

    x: (B, F) float32
    w: (1, F) float32   (PyTorch layout: out_features x in_features)
    b: (1,)   float32
    returns: (B, 1) float32
    """
    B, F = x.shape
    if F > 128:
        # TODO(synk): n_feature > 128 needs a K-tiled variant; out of scope for this demo.
        raise NotImplementedError("n_feature > 128 not supported by this kernel")

    x = x.astype(jnp.float32)
    w_vec = jnp.reshape(w, (F,)).astype(jnp.float32)
    b_vec = jnp.reshape(b, (-1,))[:1].astype(jnp.float32)

    # Pad the feature dim (with zero weights) up to a power of two so it divides 128.
    # For typical F (1, 2, 4, ...) this is a no-op.
    F_pad = max(1, pl.next_power_of_2(F))
    if F_pad != F:
        x = jnp.pad(x, ((0, 0), (0, F_pad - F)))
        w_vec = jnp.pad(w_vec, (0, F_pad - F))
    G = 128 // F_pad            # batch elements packed per 128-lane row

    # Copy-free view: row-major (B, F_pad) == flat (B*F_pad,) == (R, 128) rows.
    elems = B * F_pad
    R = pl.cdiv(elems, 128)

    # Tile rows: multiple of 8 sublanes, aim for ~4-8 grid tiles, cap at ~1 MiB/tile.
    TR = min(2048, max(8, _round_up(pl.cdiv(R, 8), 8)))
    num_tiles = pl.cdiv(R, TR)
    R_alloc = num_tiles * TR

    flat = jnp.reshape(x, (-1,))
    pad = R_alloc * 128 - elems
    if pad:
        # Only taken when B*F is not tile-aligned; for aligned batches x is never copied.
        flat = jnp.pad(flat, (0, pad))
    x2d = jnp.reshape(flat, (R_alloc, 128))

    # Block-diagonal weight matrix: W_big[g*F_pad + f, k] = w[f] if g == k else 0.
    # x2d[r, g*F_pad + f] = x[G*r + g, f], so (x2d @ W_big)[r, k] = sum_f x[G*r+k, f] * w[f].
    eye = jnp.eye(G, dtype=jnp.float32)                                  # (G, G)
    w_big = (eye[:, None, :] * w_vec[None, :, None]).reshape(F_pad * G, G)  # (128, G)

    out = pl.pallas_call(
        linear_kernel,
        out_shape=jax.ShapeDtypeStruct((R_alloc, G), jnp.float32),
        grid=(num_tiles,),
        in_specs=[
            # x tiles: (TR, 128) sublane/lane-dense blocks of the flat view.
            pl.BlockSpec((TR, 128), lambda i: (i, 0)),
            # weight matrix: whole (128, G) array, constant block -> fetched once.
            pl.BlockSpec((F_pad * G, G), lambda i: (0, 0)),
            # bias: tiny scalar array in SMEM, no per-step VMEM DMA.
            pl.BlockSpec(memory_space=pltpu.MemorySpace.SMEM),
        ],
        out_specs=pl.BlockSpec((TR, G), lambda i: (i, 0)),
        compiler_params=pltpu.CompilerParams(
            dimension_semantics=("parallel",)),
    )(x2d, w_big, b_vec)

    # out is already batch-ordered when flattened; drop padded tail, restore (B, 1).
    return out.reshape(-1)[:B].reshape(B, 1)


if __name__ == "__main__":
    key = jax.random.PRNGKey(0)
    k_x, k_w, k_b, k_x2 = jax.random.split(key, 4)

    n_feature = 4
    # PyTorch-style uniform(-1/sqrt(F), 1/sqrt(F)) init for the linear layer.
    bound = 1.0 / (n_feature ** 0.5)
    w = jax.random.uniform(k_w, (1, n_feature), jnp.float32, -bound, bound)
    b = jax.random.uniform(k_b, (1,), jnp.float32, -bound, bound)

    # Primary check: batch aligned to the tile (copy-free path, 4 grid tiles).
    batch = 1024
    x = jax.random.normal(k_x, (batch, n_feature), jnp.float32)
    y = linear_net_forward(x, w, b)
    jax.block_until_ready(y)
    # Elementwise f32 reference (same semantics as torch: y = x @ W.T + b).
    y_ref = (x * w).sum(axis=1, keepdims=True) + b
    assert y.shape == (batch, 1)
    assert jnp.allclose(y, y_ref, atol=1e-4, rtol=1e-4)

    # Small, non-aligned batch: exercises the padded-tail path.
    batch2 = 10
    x2 = jax.random.normal(k_x2, (batch2, n_feature), jnp.float32)
    y2 = linear_net_forward(x2, w, b)
    jax.block_until_ready(y2)
    y2_ref = (x2 * w).sum(axis=1, keepdims=True) + b
    assert y2.shape == (batch2, 1)
    assert jnp.allclose(y2, y2_ref, atol=1e-4, rtol=1e-4)

    print("KERNEL_OK")
</pallas_src>

<mosaic_0001>
module attributes {stable_mosaic.version = 11 : i64} {
  func.func @linear_kernel(%arg0: i32, %arg1: memref<8x128xf32, #tpu.memory_space<vmem>>, %arg2: memref<128x32xf32, #tpu.memory_space<vmem>>, %arg3: memref<1xf32, #tpu.memory_space<smem>>, %arg4: memref<8x32xf32, #tpu.memory_space<vmem>>) attributes {dimension_semantics = [#tpu.dimension_semantics<parallel>], iteration_bounds = array<i64: 4>, scalar_prefetch = 0 : i64, scratch_operands = 0 : i64, tpu.core_type = #tpu.core_type<tc>, window_params = [{transform_indices = @transform_0, window_bounds = array<i64: 8, 128>}, {pipeline_mode = #tpu.pipeline_mode<synchronous>, transform_indices = @transform_1, window_bounds = array<i64: 128, 32>}, {transform_indices = @transform_2, window_bounds = array<i64: 1>}, {transform_indices = @transform_3, window_bounds = array<i64: 8, 32>}]} {
    %c0 = arith.constant 0 : index
    %c0_0 = arith.constant 0 : index
    %0 = vector.load %arg1[%c0, %c0_0] : memref<8x128xf32, #tpu.memory_space<vmem>>, vector<8x128xf32>
    %c0_1 = arith.constant 0 : index
    %c0_2 = arith.constant 0 : index
    %1 = vector.load %arg2[%c0_1, %c0_2] : memref<128x32xf32, #tpu.memory_space<vmem>>, vector<128x32xf32>
    %cst = arith.constant dense<0.000000e+00> : vector<8x32xf32>
    %2 = tpu.matmul %0, %1, %cst {dimension_numbers = #tpu.dot_dimension_numbers<[1], [0], [0], [1], [0, 0, 1, 1], [], []>, precision = #tpu.contract_precision<fp32>} : vector<8x128xf32>, vector<128x32xf32>, vector<8x32xf32> -> vector<8x32xf32>
    %c0_3 = arith.constant 0 : index
    %3 = memref.load %arg3[%c0_3] : memref<1xf32, #tpu.memory_space<smem>>
    %4 = vector.broadcast %3 : f32 to vector<8x32xf32>
    %5 = arith.addf %2, %4 : vector<8x32xf32>
    %c0_4 = arith.constant 0 : index
    %c0_5 = arith.constant 0 : index
    %6 = vector.load %arg4[%c0_4, %c0_5] : memref<8x32xf32, #tpu.memory_space<vmem>>, vector<8x32xf32>
    tpu.vector_store %arg4[%c0_4, %c0_5], %5 {strides = array<i32>} : memref<8x32xf32, #tpu.memory_space<vmem>>, vector<8x32xf32>,
    return
  }
  func.func @transform_0(%arg0: i32) -> (i32, i32) {
    %c0_i32 = arith.constant 0 : i32
    %c0_i32_0 = arith.constant 0 : i32
    return %arg0, %c0_i32 : i32, i32
  }
  func.func @transform_1(%arg0: i32) -> (i32, i32) {
    %c0_i32 = arith.constant 0 : i32
    %c0_i32_0 = arith.constant 0 : i32
    %c0_i32_1 = arith.constant 0 : i32
    return %c0_i32, %c0_i32_0 : i32, i32
  }
  func.func @transform_2(%arg0: i32) -> i32 {
    %c0_i32 = arith.constant 0 : i32
    %c0_i32_0 = arith.constant 0 : i32
    return %c0_i32 : i32
  }
  func.func @transform_3(%arg0: i32) -> (i32, i32) {
    %c0_i32 = arith.constant 0 : i32
    %c0_i32_0 = arith.constant 0 : i32
    return %arg0, %c0_i32 : i32, i32
  }
}

</mosaic_0001>

<bundles_post_ra>
// kernel: tpu_custom_call.1
= control target key start
LH: loop header
LB: loop body
LE: loop exit
PB: predicated region body
PF: predicated region fallthrough
CT: control target
= control target key end

     0   :  { %s1116_s0 = inlined_call_operand.vmem [shape: f32[32,128], index: 0, kind: input, shape index: {}]   ;;  %s1117_s1 = inlined_call_operand.vmem [shape: f32[128,32], index: 1, kind: input, shape index: {}]   ;;  %s1118_s2 = inlined_call_operand.<no memory space> [shape: f32[1], index: 2, kind: input, shape index: {}]   ;;  %s1119_s3 = inlined_call_operand.hbm [shape: f32[32,32], index: 3, kind: output, shape index: {}]  }
   0x1   :  { %8 = sst [smem:[#allocation2]] %s1118_s2 }
   0x2   :  { %9 = vsyncpa [#allocation4], 0 }
   0x3   :  { %11 = vsyncpa [#allocation4 + $0x1], 0  ;;  %s740_s14 = smov 0   ;;  %s742_s15 = smov 0  }
   0x4   :  { %s744_s16 = smov 0   ;;  %s746_s17 = smov 0  }
   0x5 LB: > { %s761_s2 = sadd.s32 4294967295, %s715_s17   ;;  %s604_s18 = sadd.s32 4294967294, %s715_s17   ;;  %s715_s17 = sphi %s746_s17, %s1125_s17   ;;  %s711_s16 = sphi %s744_s16, %s1124_s16   ;;  %s707_s15 = sphi %s742_s15, %s1123_s15   ;;  %s703_s14 = sphi %s740_s14, %s1122_s14  }
   0x6   : > { %s765_s19 = sadd.s32 1, %s715_s17   ;;  %s92_s20 = sadd.s32 1, %s711_s16 }
   0x7   : > { %s89_s21 = ssub.s32 %s715_s17, %s765_s19  ;;  %p102_p0 = scmp.ne.s32.totalorder %s711_s16, %s707_s15 }
   0x8   : > { %p90_p1 = scmp.eq.s32.totalorder %s89_s21, 0  ;;  %p103_p2 = scmp.eq.s32.totalorder %s761_s2, 3 }
   0x9   : > { %p108_p3 = scmp.ne.s32.totalorder %s707_s15, %s703_s14  ;;  %p109_p4 = scmp.eq.s32.totalorder %s604_s18, 3 }
   0xa   : > { %s776_s22 = scalar_select %p90_p1, %s711_s16, %s92_s20  }
   0xb   : > { %p778_p5 = por %p103_p2, %p102_p0  ;;  %p782_p6 = por %p109_p4, %p108_p3 }
   0xc   : > { %p607_p7 = scmp.ge.s32.totalorder %s715_s17, 1  ;;  %p140_p8 = scmp.lt.s32.totalorder %s715_s17, 5 }
   0xe   : > { %p141_p9 = pnand %p607_p7, %p140_p8 }
   0xf   : > { %p163_p10 = scmp.lt.s32.totalorder (!%p141_p9), %s761_s2, 3  ;;  %s184_s21 = sld [smem:[#allocation2]] (!%p141_p9) }
  0x10   : > { %144 = sbr.rel (%p141_p9) target bundleno = 226 (0xe2), region = 32  ;;  %s160_s25 = sand.u32 (!%p141_p9), 1, %s707_s15  }
  0x11   : > { %s608_s26 = sshll.u32 (!%p141_p9), %s160_s25, 3  ;;  %s611_s27 = sshll.u32 (!%p141_p9), %s761_s2, 3 }
  0x12   : > { %s162_s4 = scalar_lea.vmem (!%p141_p9), [#allocation3], %s608_s26  ;;  %s530_s7 = scalar_lea.sflag (!%p141_p9), [#allocation4], %s160_s25 }
  0x13   : > { %s542_s5 = sshll.u32 (!%p141_p9), %s162_s4, 4  ;;  %s673_s11 = scalar_lea.hbm (!%p141_p9), %s1119_s3, 32  ;;  %s543_s5 = int_to_ptr.vmem [resolvable:$true] %s542_s5 }
  0x15   : > { %v183_v0 = vld [vmem:[%s1117_s1 + $0x78] sm:$0xff]  ;;  %v182_v1 = vld [vmem:[%s1117_s1 + $0x70] sm:$0xff]  ;;  %v181_v2 = vld [vmem:[%s1117_s1 + $0x68] sm:$0xff]  ;;  %s903_s30 = scalar_select %p163_p10, %s761_s2, 3  ;;  %vm527_vm0 = vcmask 261120  }
  0x16   : > { %v797_v3 = vand.u32 4294901760, %v183_v0  ;;  %v799_v4 = vand.u32 4294901760, %v182_v1  ;;  %v801_v5 = vand.u32 4294901760, %v181_v2  ;;  %v180_v6 = vld [vmem:[%s1117_s1 + $0x60] sm:$0xff]  ;;  %v179_v7 = vld [vmem:[%s1117_s1 + $0x58] sm:$0xff]  ;;  %v178_v8 = vld [vmem:[%s1117_s1 + $0x50] sm:$0xff] }
  0x17   : > { %v812_v9 = vand.u32 4294901760, %v180_v6  ;;  %v814_v10 = vand.u32 4294901760, %v179_v7  ;;  %v816_v11 = vand.u32 4294901760, %v178_v8  ;;  %v177_v12 = vld [vmem:[%s1117_s1 + $0x48] sm:$0xff]  ;;  %v176_v13 = vld [vmem:[%s1117_s1 + $0x40] sm:$0xff]  ;;  %v175_v21 = vld [vmem:[%s1117_s1 + $0x38] sm:$0xff] }
  0x18   : > { %187 = vmatpush.msra.mxu0 %v797_v3  ;;  %v826_v14 = vsub.f32 %v183_v0, %v797_v3  ;;  %v829_v15 = vsub.f32 %v182_v1, %v799_v4  ;;  %v832_v16 = vsub.f32 %v181_v2, %v801_v5  ;;  %v834_v17 = vand.u32 4294901760, %v177_v12  ;;  %383 = vmatpush.msra.mxu3 %v797_v3  ;;  %v174_v34 = vld [vmem:[%s1117_s1 + $0x30] sm:$0xff]  ;;  %v173_v35 = vld [vmem:[%s1117_s1 + $0x28] sm:$0xff]  ;;  %v172_v42 = vld [vmem:[%s1117_s1 + $0x20] sm:$0xff]  ;;  %s609_s8 = sshll.u32 %s903_s30, 3  ;;  %s540_s30 = scalar_lea.hbm %s1119_s3, %s611_s27 }
  0x19   : > { %v838_v18 = vsub.f32 %v180_v6, %v812_v9  ;;  %v841_v19 = vsub.f32 %v179_v7, %v814_v10  ;;  %v843_v20 = vand.u32 4294901760, %v176_v13  ;;  %v853_v25 = vsub.f32 %v178_v8, %v816_v11  ;;  %v171_v47 = vld [vmem:[%s1117_s1 + $0x18] sm:$0xff]  ;;  %v170_v53 = vld [vmem:[%s1117_s1 + $0x10] sm:$0xff]  ;;  %v169_v61 = vld [vmem:[%s1117_s1 + $0x8] sm:$0xff]  ;;  %s166_s13 = scalar_lea.vmem %s1116_s0, %s609_s8  ;;  %s544_s6 = sshll.u32 %s540_s30, 4  ;;  %s545_s6 = int_to_ptr.hbm [resolvable:$true] %s544_s6 }
  0x1a   : > { %189 = vmatpush.msra.mxu0 %v799_v4  ;;  %v229_v22 = vand.u32 4294901760, %v826_v14  ;;  %v235_v23 = vand.u32 4294901760, %v829_v15  ;;  %v241_v24 = vand.u32 4294901760, %v832_v16  ;;  %330 = vmatpush.msra.mxu2 %v826_v14  ;;  %v859_v28 = vsub.f32 %v177_v12, %v834_v17  ;;  %v168_v2 = vld [vmem:[%s1117_s1] sm:$0xff]  ;;  %s667_s8 = sshra.s32 %s545_s6, 4  ;;  %s668_s8 = int_to_ptr.hbm [resolvable:$true] %s667_s8 }
  0x1b   : > { %v247_v26 = vand.u32 4294901760, %v838_v18  ;;  %v253_v27 = vand.u32 4294901760, %v841_v19  ;;  %385 = vmatpush.msra.mxu3 %v799_v4  ;;  %v873_v32 = vand.u32 4294901760, %v175_v21  ;;  %v877_v33 = vsub.f32 %v176_v13, %v843_v20  ;;  %s669_s2 = scalar_lea.hbm %s668_s8, 8  ;;  %p674_p0 = scmp.lt.s32.totalorder %s668_s8, %s1119_s3 }
  0x1c   : > { %v230_v29 = vsub.f32 %v826_v14, %v229_v22  ;;  %191 = vmatpush.msra.mxu0 %v801_v5  ;;  %v236_v30 = vsub.f32 %v829_v15, %v235_v23  ;;  %v242_v31 = vsub.f32 %v832_v16, %v241_v24  ;;  %333 = vmatpush.msra.mxu2 %v829_v15  ;;  %v259_v39 = vand.u32 4294901760, %v853_v25  ;;  %p670_p11 = scmp.ne.s32.totalorder %s668_s8, %s669_s2  ;;  %p675_p1 = scmp.lt.s32.totalorder %s673_s11, %s669_s2 }
  0x1d   : > { %387 = vmatpush.msra.mxu3 %v801_v5  ;;  %v248_v38 = vsub.f32 %v838_v18, %v247_v26  ;;  %v254_v40 = vsub.f32 %v841_v19, %v253_v27  ;;  %v265_v41 = vand.u32 4294901760, %v859_v28  ;;  %v906_v44 = vand.u32 4294901760, %v174_v34 }
  0x1e   : > { %v231_v36 = vand.u32 4294901760, %v230_v29  ;;  %v237_v37 = vand.u32 4294901760, %v236_v30  ;;  %193 = vmatpush.msra.mxu0 %v812_v9  ;;  %336 = vmatpush.msra.mxu2 %v832_v16  ;;  %v243_v43 = vand.u32 4294901760, %v242_v31  ;;  %v909_v45 = vsub.f32 %v175_v21, %v873_v32  ;;  %v167_v29 = vld [vmem:[%s166_s13] sm:$0xff]  ;;  %p671_p12 = pnand %p670_p11, %p778_p5  ;;  %p676_p2 = por %p675_p1, %p674_p0 }
  0x1f   : > { %389 = vmatpush.msra.mxu3 %v812_v9  ;;  %v911_v46 = vand.u32 4294901760, %v173_v35  ;;  %v271_v48 = vand.u32 4294901760, %v877_v33  ;;  %v249_v49 = vand.u32 4294901760, %v248_v38  ;;  %v260_v50 = vsub.f32 %v853_v25, %v259_v39 }
  0x20   : > { %232 = vmatpush.msra.mxu1 %v231_v36  ;;  %195 = vmatpush.msra.mxu0 %v814_v10  ;;  %v924_v51 = vsub.f32 %v174_v34, %v906_v44  ;;  %v926_v52 = vand.u32 4294901760, %v172_v42  ;;  %v931_v54 = vand.u32 4294901760, %v171_v47  ;;  %v255_v55 = vand.u32 4294901760, %v254_v40  ;;  %p672_p13 = pneg %p671_p12 }
  0x21   : > { %339 = vmatpush.msra.mxu2 %v838_v18  ;;  %391 = vmatpush.msra.mxu3 %v814_v10  ;;  %v266_v56 = vsub.f32 %v859_v28, %v265_v41  ;;  %v277_v57 = vand.u32 4294901760, %v909_v45  ;;  %v942_v58 = vsub.f32 %v173_v35, %v911_v46  ;;  %v272_v59 = vsub.f32 %v877_v33, %v271_v48 }
  0x22   : > { %238 = vmatpush.msra.mxu1 %v237_v37  ;;  %197 = vmatpush.msra.mxu0 %v816_v11  ;;  %v947_v60 = vand.u32 4294901760, %v170_v53  ;;  %v261_v62 = vand.u32 4294901760, %v260_v50  ;;  %v283_v63 = vand.u32 4294901760, %v924_v51  ;;  %v957_v0 = vsub.f32 %v172_v42, %v926_v52  ;;  %p677_p3 = pnand %p676_p2, %p672_p13 }
  0x23   : > { %342 = vmatpush.msra.mxu2 %v841_v19  ;;  %393 = vmatpush.msra.mxu3 %v816_v11  ;;  %v963_v1 = vsub.f32 %v171_v47, %v931_v54  ;;  %v267_v6 = vand.u32 4294901760, %v266_v56  ;;  %v278_v7 = vsub.f32 %v909_v45, %v277_v57  ;;  %v289_v8 = vand.u32 4294901760, %v942_v58 }
  0x24   : > { %244 = vmatpush.msra.mxu1 %v243_v43  ;;  %199 = vmatpush.msra.mxu0 %v834_v17  ;;  %v975_v12 = vand.u32 4294901760, %v169_v61  ;;  %v273_v13 = vand.u32 4294901760, %v272_v59  ;;  %v978_v21 = vsub.f32 %v170_v53, %v947_v60  ;;  %v284_v30 = vsub.f32 %v924_v51, %v283_v63 }
  0x25   : > { %345 = vmatpush.msra.mxu2 %v853_v25  ;;  %395 = vmatpush.msra.mxu3 %v834_v17  ;;  %v295_v31 = vand.u32 4294901760, %v957_v0  ;;  %v987_v34 = vand.u32 4294901760, %v168_v2  ;;  %v989_v35 = vand.u32 4294901760, %v167_v29  ;;  %v301_v36 = vand.u32 4294901760, %v963_v1 }
  0x26   : > { %250 = vmatpush.msra.mxu1 %v249_v49  ;;  %201 = vmatpush.msra.mxu0 %v843_v20  ;;  %v279_v37 = vand.u32 4294901760, %v278_v7  ;;  %v290_v38 = vsub.f32 %v942_v58, %v289_v8  ;;  %v999_v40 = vsub.f32 %v169_v61, %v975_v12  ;;  %v285_v43 = vand.u32 4294901760, %v284_v30 }
  0x27   : > { %348 = vmatpush.msra.mxu2 %v859_v28  ;;  %397 = vmatpush.msra.mxu3 %v843_v20  ;;  %v219_v42 = vsub.f32 %v167_v29, %v989_v35  ;;  %v296_v47 = vsub.f32 %v957_v0, %v295_v31  ;;  %v307_v49 = vand.u32 4294901760, %v978_v21  ;;  %v1010_v50 = vsub.f32 %v168_v2, %v987_v34 }
  0x28   : > { %256 = vmatpush.msra.mxu1 %v255_v55  ;;  %203 = vmatpush.msra.mxu0 %v873_v32  ;;  %v291_v53 = vand.u32 4294901760, %v290_v38  ;;  %v302_v55 = vsub.f32 %v963_v1, %v301_v36  ;;  %v313_v56 = vand.u32 4294901760, %v999_v40 }
  0x29   : > { %351 = vmatpush.msra.mxu2 %v877_v33  ;;  %399 = vmatpush.msra.mxu3 %v873_v32  ;;  %v220_v59 = vand.u32 4294901760, %v219_v42  ;;  %v297_v61 = vand.u32 4294901760, %v296_v47  ;;  %v319_v2 = vand.u32 4294901760, %v1010_v50 }
  0x2a   : > { %262 = vmatpush.msra.mxu1 %v261_v62  ;;  %205 = vmatpush.msra.mxu0 %v906_v44  ;;  %v308_v62 = vsub.f32 %v978_v21, %v307_v49  ;;  %v314_v7 = vsub.f32 %v999_v40, %v313_v56 }
  0x2b   : > { %354 = vmatpush.msra.mxu2 %v909_v45  ;;  %401 = vmatpush.msra.mxu3 %v906_v44  ;;  %v320_v30 = vsub.f32 %v1010_v50, %v319_v2 }
  0x2c   : > { %268 = vmatpush.msra.mxu1 %v267_v6  ;;  %207 = vmatpush.msra.mxu0 %v911_v46  ;;  %v303_v6 = vand.u32 4294901760, %v302_v55  ;;  %v309_v29 = vand.u32 4294901760, %v308_v62 }
  0x2d   : > { %357 = vmatpush.msra.mxu2 %v924_v51  ;;  %403 = vmatpush.msra.mxu3 %v911_v46 }
  0x2e   : > { %274 = vmatpush.msra.mxu1 %v273_v13  ;;  %209 = vmatpush.msra.mxu0 %v926_v52  ;;  %v221_v13 = vsub.f32 %v219_v42, %v220_v59 }
  0x2f   : > { %360 = vmatpush.msra.mxu2 %v942_v58  ;;  %405 = vmatpush.msra.mxu3 %v926_v52 }
  0x30   : > { %280 = vmatpush.msra.mxu1 %v279_v37  ;;  %211 = vmatpush.msra.mxu0 %v931_v54  ;;  %v315_v37 = vand.u32 4294901760, %v314_v7  ;;  %v222_v38 = vand.u32 4294901760, %v221_v13 }
  0x31   : > { %363 = vmatpush.msra.mxu2 %v957_v0  ;;  %407 = vmatpush.msra.mxu3 %v931_v54 }
  0x32   : > { %286 = vmatpush.msra.mxu1 %v285_v43  ;;  %213 = vmatpush.msra.mxu0 %v947_v60  ;;  %v321_v43 = vand.u32 4294901760, %v320_v30 }
  0x33   : > { %366 = vmatpush.msra.mxu2 %v963_v1  ;;  %409 = vmatpush.msra.mxu3 %v947_v60 }
  0x34   : > { %292 = vmatpush.msra.mxu1 %v291_v53  ;;  %215 = vmatpush.msra.mxu0 %v975_v12 }
  0x35   : > { %369 = vmatpush.msra.mxu2 %v978_v21  ;;  %411 = vmatpush.msra.mxu3 %v975_v12 }
  0x36   : > { %298 = vmatpush.msra.mxu1 %v297_v61  ;;  %217 = vmatpush.msra.mxu0 %v987_v34 }
  0x37   : > { %372 = vmatpush.msra.mxu2 %v999_v40  ;;  %413 = vmatpush.msra.mxu3 %v987_v34 }
  0x38   : > { %424 = vmatpush.msrb.mxu0 %v229_v22  ;;  %304 = vmatpush.msra.mxu1 %v303_v6 }
  0x39   : > { %375 = vmatpush.msra.mxu2 %v1010_v50  ;;  %417 = vmatmul.f32.vlgmr.msra.gmra.mxu3 %v220_v59 }
  0x3a   : > { %428 = vmatpush.msrb.mxu0 %v235_v23  ;;  %310 = vmatpush.msra.mxu1 %v309_v29 }
  0x3b   : > { %378 = vmatmul.f32.vlgmr.msra.gmra.mxu2 %v219_v42  ;;  %223 = vmatmul.f32.vlgmr.msra.gmra.mxu0 %v222_v38 }
  0x3c   : > { %432 = vmatpush.msrb.mxu0 %v241_v24  ;;  %316 = vmatpush.msra.mxu1 %v315_v37 }
  0x3e   : > { %436 = vmatpush.msrb.mxu0 %v247_v26  ;;  %322 = vmatpush.msra.mxu1 %v321_v43 }
  0x3f   : > { %324 = vmatmul.f32.vlgmr.msra.gmra.mxu1 %v989_v35 }
  0x40   : > { %491 = vmatpush.msrb.mxu1 %v797_v3  ;;  %440 = vmatpush.msrb.mxu0 %v253_v27  ;;  %v185_v3 = vstv %s184_s21 }
  0x42   : > { %493 = vmatpush.msrb.mxu1 %v799_v4  ;;  %444 = vmatpush.msrb.mxu0 %v259_v39 }
  0x44   : > { %495 = vmatpush.msrb.mxu1 %v801_v5  ;;  %448 = vmatpush.msrb.mxu0 %v265_v41 }
  0x46   : > { %497 = vmatpush.msrb.mxu1 %v812_v9  ;;  %452 = vmatpush.msrb.mxu0 %v271_v48 }
  0x48   : > { %499 = vmatpush.msrb.mxu1 %v814_v10  ;;  %456 = vmatpush.msrb.mxu0 %v277_v57 }
  0x4a   : > { %501 = vmatpush.msrb.mxu1 %v816_v11  ;;  %460 = vmatpush.msrb.mxu0 %v283_v63 }
  0x4c   : > { %503 = vmatpush.msrb.mxu1 %v834_v17  ;;  %464 = vmatpush.msrb.mxu0 %v289_v8 }
  0x4e   : > { %505 = vmatpush.msrb.mxu1 %v843_v20  ;;  %468 = vmatpush.msrb.mxu0 %v295_v31 }
  0x50   : > { %507 = vmatpush.msrb.mxu1 %v873_v32  ;;  %472 = vmatpush.msrb.mxu0 %v301_v36 }
  0x52   : > { %509 = vmatpush.msrb.mxu1 %v906_v44  ;;  %476 = vmatpush.msrb.mxu0 %v307_v49 }
  0x54   : > { %511 = vmatpush.msrb.mxu1 %v911_v46  ;;  %480 = vmatpush.msrb.mxu0 %v313_v56 }
  0x56   : > { %513 = vmatpush.msrb.mxu1 %v926_v52  ;;  %484 = vmatpush.msrb.mxu0 %v319_v2 }
  0x57   : > { %486 = vmatmul.f32.vlgmr.msrb.gmra.mxu0 %v989_v35 }
  0x58   : > { %515 = vmatpush.msrb.mxu1 %v931_v54 }
  0x5a   : > { %517 = vmatpush.msrb.mxu1 %v947_v60 }
  0x5c   : > { %519 = vmatpush.msrb.mxu1 %v975_v12 }
  0x5e   : > { %521 = vmatpush.msrb.mxu1 %v987_v34 }
  0x5f   : > { %523 = vmatmul.f32.vlgmr.msrb.gmra.mxu1 %v989_v35 }
  0xb8   : > { %v224_v4 = vpop.f32.mrf.mxu0 }
  0xb9   : > { %v225_v5 = vadd.f32 %v224_v4, %v185_v3 }
  0xbc   : > { %v325_v9 = vpop.f32.mrf.mxu1  ;;  %v418_v15 = vpop.f32.mrf.mxu3 }
  0xbd   : > { %v326_v10 = vadd.f32 %v325_v9, %v225_v5 }
  0xbe   : > { %v379_v11 = vpop.f32.mrf.mxu2 }
  0xbf   : > { %v380_v14 = vadd.f32 %v379_v11, %v326_v10 }
  0xc1   : > { %v419_v16 = vadd.f32 %v418_v15, %v380_v14 }
  0xd4   : > { %v487_v17 = vpop.f32.mrf.mxu0 }
  0xd5   : > { %v488_v18 = vadd.f32 %v487_v17, %v419_v16 }
  0xdc   : > { %v524_v19 = vpop.f32.mrf.mxu1 }
  0xdd   : > { %v525_v20 = vadd.f32 %v524_v19, %v488_v18 }
  0xdf   : > { %528 = vst.msk [vmem:[%s162_s4] sm:$0xff] %vm527_vm0, %v525_v20 }
  0xe0   : > { %680 = shalt.err (!%p677_p3)
}
  0xe1   : > { %614 = dma.vmem_to_hbm [thread:$0]  (%p778_p5), %s543_s5, 128, %s545_s6, %s530_s7  }
  0xe2 PF: > { %p620_p4 = scmp.ge.s32.totalorder %s715_s17, 2  ;;  %s556_s18 = sand.u32 1, %s703_s14  }
  0xe3   : > { %s557_s20 = scalar_lea.sflag [#allocation4], %s556_s18 }
  0xe4   : > { %p617_p7 = pnand %p620_p4, %p782_p6 }
  0xe6   : > { %p618_p8 = pneg %p617_p7 }
  0xe8   : > { %698 = dma.done.wait (%p618_p8), %s557_s20, 128  }
  0xe9   : > { %700 = vsyncadd (%p618_p8), %s557_s20, 4294967168  ;;  %p14_p9 = scmp.ge.s32.totalorder %s765_s19, 6   ;;  %s1122_s14 = smov %s707_s15 }
  0xea   : > { %s1123_s15 = smov %s711_s16  ;;  %s1124_s16 = smov %s776_s22 }
  0xeb   : > { %s1125_s17 = smov %s765_s19  ;;  %16 = sbr.rel (!%p14_p9) target bundleno = 5 (0x5), region = 67 }
  0xf0   :  { %563 = vsyncpa [#allocation4], 1 }
  0xf1   :  { %565 = vsyncpa [#allocation4 + $0x1], 1 }

</bundles_post_ra>
